<compile_context>
chip_gen: v7x
topology: tpu7x:2x2x1
jax: 0.10.0
libtpu: 0.0.40
codegen_flags: <defaults>
</compile_context>

<pallas_src>
import functools

import jax
import jax.numpy as jnp
from jax.experimental import pallas as pl
from jax.experimental.pallas import tpu as pltpu

LANE = 128
SUBLANE = 8


def _round_up(v, m):
    return ((v + m - 1) // m) * m


def _pad_to(a, target_shape):
    pads = [(0, t - s) for s, t in zip(a.shape, target_shape)]
    if any(hi for _, hi in pads):
        return jnp.pad(a, pads)
    return a


# ----------------------------------------------------------------------------
# Kernel
# ----------------------------------------------------------------------------
def _mlp_kernel(*refs, n_hidden_linears, activation, compute_dtype):
    """Fused MLP forward on one batch tile.

    refs (n_hidden_linears > 0):
        x[TB,Ip], w0[Ip,Hp], b0[1,Hp], wh[L,Hp,Hp], bh[L,1,Hp],
        wl[Hp,Op], bl[1,Op], o[TB,Op]
    refs (n_hidden_linears == 0): same without wh/bh.
    """
    x_ref, w0_ref, b0_ref = refs[0], refs[1], refs[2]
    if n_hidden_linears > 0:
        wh_ref, bh_ref = refs[3], refs[4]
        wl_ref, bl_ref, o_ref = refs[5], refs[6], refs[7]
    else:
        wh_ref = bh_ref = None
        wl_ref, bl_ref, o_ref = refs[3], refs[4], refs[5]

    # first_linear (x already streamed in compute dtype; biases resident f32)
    h = jnp.dot(x_ref[...], w0_ref[...], preferred_element_type=jnp.float32)
    h = h + b0_ref[...]

    # hidden_linears (static unroll; layer counts here are small)
    for i in range(n_hidden_linears):
        h = activation(h)
        h = jnp.dot(h.astype(compute_dtype), wh_ref[i],
                    preferred_element_type=jnp.float32)
        h = h + bh_ref[i]                       # bh_ref[i] is [1, Hp]

    # last_linear
    h = activation(h)
    out = jnp.dot(h.astype(compute_dtype), wl_ref[...],
                  preferred_element_type=jnp.float32)
    out = out + bl_ref[...]
    o_ref[...] = out.astype(o_ref.dtype)


# ----------------------------------------------------------------------------
# Wrapper
# ----------------------------------------------------------------------------
_ACTIVATIONS = {
    "relu": lambda h: jnp.maximum(h, 0.0),
    "tanh": jnp.tanh,
    "sigmoid": jax.nn.sigmoid,
    "gelu": jax.nn.gelu,
}


def simple_network_forward(x, params, *, activation="relu", block_b=1024,
                           compute_dtype=None):
    """Fused MLP forward.

    x      : [B, n_inputs]
    params : dict with w0 [I,H], b0 [H], wh [L-1,H,H], bh [L-1,H],
             wl [H,O], bl [O]  (weights stored [in, out]).
    compute_dtype: dtype fed to the MXU (default: weight dtype). Accumulation
                   and elementwise math stay f32.
    """
    act_fn = _ACTIVATIONS[activation] if isinstance(activation, str) else activation

    w0, b0 = params["w0"], params["b0"]
    wh, bh = params["wh"], params["bh"]
    wl, bl = params["wl"], params["bl"]

    B, I = x.shape
    H = w0.shape[1]
    O = wl.shape[1]
    L = int(wh.shape[0])                  # hidden Linear layers between first & last

    out_dtype = x.dtype
    cdt = jnp.dtype(w0.dtype) if compute_dtype is None else jnp.dtype(compute_dtype)

    # Lane-dense padded widths.
    I_pad = _round_up(I, LANE)
    H_pad = _round_up(H, LANE)
    O_pad = _round_up(O, LANE)

    # Padded, compute-dtype weights; f32 resident biases (pre-shaped).
    w0_p = _pad_to(w0, (I_pad, H_pad)).astype(cdt)
    wl_p = _pad_to(wl, (H_pad, O_pad)).astype(cdt)
    b0_p = _pad_to(b0, (H_pad,)).astype(jnp.float32).reshape(1, H_pad)
    bl_p = _pad_to(bl, (O_pad,)).astype(jnp.float32).reshape(1, O_pad)
    if L > 0:
        wh_p = _pad_to(wh, (L, H_pad, H_pad)).astype(cdt)
        bh_p = _pad_to(bh, (L, H_pad)).astype(jnp.float32).reshape(L, 1, H_pad)

    # --- VMEM budgeting & batch-tile selection --------------------------------
    wbytes = cdt.itemsize
    weights_bytes = ((I_pad + L * H_pad + O_pad) * H_pad * wbytes
                     + (H_pad + L * H_pad + O_pad) * 4)
    x_bytes = cdt.itemsize
    o_bytes = jnp.dtype(out_dtype).itemsize

    def tile_bytes(tb):
        return (2 * tb * I_pad * x_bytes        # double-buffered x tile
                + 2 * tb * O_pad * o_bytes      # double-buffered out tile
                + 2 * tb * H_pad * 4)           # f32 intermediates headroom

    try:
        vmem_cap = pltpu.get_tpu_info().vmem_capacity_bytes
    except Exception:
        vmem_cap = 64 << 20                     # conservative (v7x per-TC)
    budget = int(vmem_cap * 0.7)

    # Tile count that minimizes padding waste; >=2 steps keeps both v7x TCs busy.
    n_tiles = max(pl.cdiv(B, block_b), 1)
    if n_tiles < 2 and B > SUBLANE:
        n_tiles = 2
    TB = _round_up(pl.cdiv(B, n_tiles), SUBLANE)
    while TB > SUBLANE and weights_bytes + tile_bytes(TB) > budget:
        TB = _round_up(TB // 2, SUBLANE)
    B_pad = _round_up(B, TB)
    # TODO(synk): if weights_bytes alone outgrows VMEM (very large L*H^2), switch
    # to a layer-pipelined wh path (pltpu.emit_pipeline over wh slabs) instead of
    # the all-resident design used here.

    vmem_limit = min(int(vmem_cap * 0.9),
                     max(2 * weights_bytes + tile_bytes(TB) + (8 << 20), 32 << 20))

    x_p = _pad_to(x, (B_pad, I_pad)).astype(cdt)

    grid = (B_pad // TB,)
    kernel = functools.partial(_mlp_kernel, n_hidden_linears=L,
                               activation=act_fn, compute_dtype=cdt)

    args = [x_p, w0_p, b0_p]
    if L > 0:
        args += [wh_p, bh_p]
    args += [wl_p, bl_p]

    def run(single_buffer_weights):
        def const_spec(shape):
            idx = lambda i, _n=len(shape): (0,) * _n
            if single_buffer_weights:
                return pl.BlockSpec(shape, idx, pipeline_mode=pl.Buffered(1))
            return pl.BlockSpec(shape, idx)

        in_specs = [pl.BlockSpec((TB, I_pad), lambda i: (i, 0)),
                    const_spec((I_pad, H_pad)),
                    const_spec((1, H_pad))]
        if L > 0:
            in_specs += [const_spec((L, H_pad, H_pad)),
                         const_spec((L, 1, H_pad))]
        in_specs += [const_spec((H_pad, O_pad)), const_spec((1, O_pad))]

        return pl.pallas_call(
            kernel,
            out_shape=jax.ShapeDtypeStruct((B_pad, O_pad), out_dtype),
            grid=grid,
            in_specs=in_specs,
            out_specs=pl.BlockSpec((TB, O_pad), lambda i: (i, 0)),
            compiler_params=pltpu.CompilerParams(
                dimension_semantics=("parallel",),   # megacore sharding on v7x
                vmem_limit_bytes=int(vmem_limit),
            ),
        )(*args)

    try:
        out_padded = run(True)      # single-buffered resident weights
    except Exception:
        out_padded = run(False)     # fallback: default double buffering

    return out_padded[:B, :O]


# ----------------------------------------------------------------------------
# Parameter init (mirrors the PyTorch module) + pure-JAX reference
# ----------------------------------------------------------------------------
def init_params(key, *, n_inputs, n_outputs, n_neurons_per_hidden_layer,
                n_hidden_layers, dtype=jnp.float32):
    """weights: kaiming_normal_ (fan_in, gain=sqrt(2)); biases: nn.Linear
    default U(-1/sqrt(fan_in), 1/sqrt(fan_in)). Weights returned as [in, out]."""
    assert n_hidden_layers >= 1, n_hidden_layers
    H = n_neurons_per_hidden_layer
    ks = jax.random.split(key, 2 * (n_hidden_layers + 1))

    def kaiming(k, fan_in, fan_out):
        std = (2.0 / fan_in) ** 0.5
        return (jax.random.normal(k, (fan_out, fan_in), dtype) * std).T

    def bias(k, fan_in, fan_out):
        bound = 1.0 / (fan_in ** 0.5)
        return jax.random.uniform(k, (fan_out,), dtype, -bound, bound)

    w0 = kaiming(ks[0], n_inputs, H)
    b0 = bias(ks[1], n_inputs, H)

    n_hid = n_hidden_layers - 1
    wh_list, bh_list = [], []
    for i in range(n_hid):
        wh_list.append(kaiming(ks[2 + 2 * i], H, H))
        bh_list.append(bias(ks[3 + 2 * i], H, H))
    wh = jnp.stack(wh_list) if n_hid > 0 else jnp.zeros((0, H, H), dtype)
    bh = jnp.stack(bh_list) if n_hid > 0 else jnp.zeros((0, H), dtype)

    wl = kaiming(ks[-2], H, n_outputs)
    bl = bias(ks[-1], H, n_outputs)
    return {"w0": w0, "b0": b0, "wh": wh, "bh": bh, "wl": wl, "bl": bl}


def reference_forward(x, params, *, activation="relu"):
    act_fn = _ACTIVATIONS[activation] if isinstance(activation, str) else activation
    h = x @ params["w0"] + params["b0"]
    for i in range(params["wh"].shape[0]):
        h = act_fn(h)
        h = h @ params["wh"][i] + params["bh"][i]
    h = act_fn(h)
    return h @ params["wl"] + params["bl"]


# ----------------------------------------------------------------------------
if __name__ == "__main__":
    key = jax.random.PRNGKey(0)
    k_param, k_x, k_param1 = jax.random.split(key, 3)

    B = 8
    n_inputs = 32
    n_outputs = 16
    H = 64
    n_hidden_layers = 3  # -> 2 hidden Linear layers between first and last

    params = init_params(k_param, n_inputs=n_inputs, n_outputs=n_outputs,
                         n_neurons_per_hidden_layer=H,
                         n_hidden_layers=n_hidden_layers, dtype=jnp.float32)
    x = jax.random.normal(k_x, (B, n_inputs), jnp.float32)

    out = simple_network_forward(x, params, activation="relu")
    jax.block_until_ready(out)
    ref = reference_forward(x, params, activation="relu")
    assert out.shape == (B, n_outputs), out.shape
    assert jnp.allclose(out, ref, atol=1e-4, rtol=1e-4), \
        float(jnp.max(jnp.abs(out - ref)))

    # Degenerate case: n_hidden_layers == 1 (no stacked hidden weights).
    params1 = init_params(k_param1, n_inputs=n_inputs, n_outputs=n_outputs,
                          n_neurons_per_hidden_layer=H,
                          n_hidden_layers=1, dtype=jnp.float32)
    out1 = simple_network_forward(x, params1, activation="relu")
    jax.block_until_ready(out1)
    ref1 = reference_forward(x, params1, activation="relu")
    assert jnp.allclose(out1, ref1, atol=1e-4, rtol=1e-4), \
        float(jnp.max(jnp.abs(out1 - ref1)))

    print("KERNEL_OK")
</pallas_src>

<mosaic_0001>
module attributes {stable_mosaic.version = 11 : i64} {
  func.func @_mlp_kernel(%arg0: i32, %arg1: memref<8x128xf32, #tpu.memory_space<vmem>>, %arg2: memref<128x128xf32, #tpu.memory_space<vmem>>, %arg3: memref<1x128xf32, #tpu.memory_space<vmem>>, %arg4: memref<2x128x128xf32, #tpu.memory_space<vmem>>, %arg5: memref<2x1x128xf32, #tpu.memory_space<vmem>>, %arg6: memref<128x128xf32, #tpu.memory_space<vmem>>, %arg7: memref<1x128xf32, #tpu.memory_space<vmem>>, %arg8: memref<8x128xf32, #tpu.memory_space<vmem>>) attributes {dimension_semantics = [#tpu.dimension_semantics<parallel>], iteration_bounds = array<i64: 1>, scalar_prefetch = 0 : i64, scratch_operands = 0 : i64, tpu.core_type = #tpu.core_type<tc>, window_params = [{transform_indices = @transform_0, window_bounds = array<i64: 8, 128>}, {pipeline_mode = #tpu.pipeline_mode<synchronous>, transform_indices = @transform_1, window_bounds = array<i64: 128, 128>}, {pipeline_mode = #tpu.pipeline_mode<synchronous>, transform_indices = @transform_2, window_bounds = array<i64: 1, 128>}, {pipeline_mode = #tpu.pipeline_mode<synchronous>, transform_indices = @transform_3, window_bounds = array<i64: 2, 128, 128>}, {pipeline_mode = #tpu.pipeline_mode<synchronous>, transform_indices = @transform_4, window_bounds = array<i64: 2, 1, 128>}, {pipeline_mode = #tpu.pipeline_mode<synchronous>, transform_indices = @transform_5, window_bounds = array<i64: 128, 128>}, {pipeline_mode = #tpu.pipeline_mode<synchronous>, transform_indices = @transform_6, window_bounds = array<i64: 1, 128>}, {transform_indices = @transform_7, window_bounds = array<i64: 8, 128>}]} {
    %c0 = arith.constant 0 : index
    %c0_0 = arith.constant 0 : index
    %0 = vector.load %arg1[%c0, %c0_0] : memref<8x128xf32, #tpu.memory_space<vmem>>, vector<8x128xf32>
    %c0_1 = arith.constant 0 : index
    %c0_2 = arith.constant 0 : index
    %1 = vector.load %arg2[%c0_1, %c0_2] : memref<128x128xf32, #tpu.memory_space<vmem>>, vector<128x128xf32>
    %cst = arith.constant dense<0.000000e+00> : vector<8x128xf32>
    %2 = tpu.matmul %0, %1, %cst {dimension_numbers = #tpu.dot_dimension_numbers<[1], [0], [0], [1], [0, 0, 1, 1], [], []>} : vector<8x128xf32>, vector<128x128xf32>, vector<8x128xf32> -> vector<8x128xf32>
    %c0_3 = arith.constant 0 : index
    %c0_4 = arith.constant 0 : index
    %3 = vector.load %arg3[%c0_3, %c0_4] : memref<1x128xf32, #tpu.memory_space<vmem>>, vector<1x128xf32>
    %4 = vector.broadcast %3 : vector<1x128xf32> to vector<8x128xf32>
    %5 = arith.addf %2, %4 : vector<8x128xf32>
    %cst_5 = arith.constant 0.000000e+00 : f32
    %6 = vector.broadcast %cst_5 : f32 to vector<8x128xf32>
    %7 = arith.maximumf %5, %6 : vector<8x128xf32>
    %c0_6 = arith.constant 0 : index
    %c0_7 = arith.constant 0 : index
    %c0_8 = arith.constant 0 : index
    %8 = vector.load %arg4[%c0_6, %c0_7, %c0_8] : memref<2x128x128xf32, #tpu.memory_space<vmem>>, vector<1x128x128xf32>
    %9 = vector.shape_cast %8 : vector<1x128x128xf32> to vector<128x128xf32>
    %cst_9 = arith.constant dense<0.000000e+00> : vector<8x128xf32>
    %10 = tpu.matmul %7, %9, %cst_9 {dimension_numbers = #tpu.dot_dimension_numbers<[1], [0], [0], [1], [0, 0, 1, 1], [], []>} : vector<8x128xf32>, vector<128x128xf32>, vector<8x128xf32> -> vector<8x128xf32>
    %c0_10 = arith.constant 0 : index
    %c0_11 = arith.constant 0 : index
    %c0_12 = arith.constant 0 : index
    %11 = vector.load %arg5[%c0_10, %c0_11, %c0_12] : memref<2x1x128xf32, #tpu.memory_space<vmem>>, vector<1x1x128xf32>
    %12 = vector.shape_cast %11 : vector<1x1x128xf32> to vector<1x128xf32>
    %13 = vector.broadcast %12 : vector<1x128xf32> to vector<8x128xf32>
    %14 = arith.addf %10, %13 : vector<8x128xf32>
    %cst_13 = arith.constant 0.000000e+00 : f32
    %15 = vector.broadcast %cst_13 : f32 to vector<8x128xf32>
    %16 = arith.maximumf %14, %15 : vector<8x128xf32>
    %c1 = arith.constant 1 : index
    %c0_14 = arith.constant 0 : index
    %c0_15 = arith.constant 0 : index
    %17 = vector.load %arg4[%c1, %c0_14, %c0_15] : memref<2x128x128xf32, #tpu.memory_space<vmem>>, vector<1x128x128xf32>
    %18 = vector.shape_cast %17 : vector<1x128x128xf32> to vector<128x128xf32>
    %cst_16 = arith.constant dense<0.000000e+00> : vector<8x128xf32>
    %19 = tpu.matmul %16, %18, %cst_16 {dimension_numbers = #tpu.dot_dimension_numbers<[1], [0], [0], [1], [0, 0, 1, 1], [], []>} : vector<8x128xf32>, vector<128x128xf32>, vector<8x128xf32> -> vector<8x128xf32>
    %c1_17 = arith.constant 1 : index
    %c0_18 = arith.constant 0 : index
    %c0_19 = arith.constant 0 : index
    %20 = vector.load %arg5[%c1_17, %c0_18, %c0_19] : memref<2x1x128xf32, #tpu.memory_space<vmem>>, vector<1x1x128xf32>
    %21 = vector.shape_cast %20 : vector<1x1x128xf32> to vector<1x128xf32>
    %22 = vector.broadcast %21 : vector<1x128xf32> to vector<8x128xf32>
    %23 = arith.addf %19, %22 : vector<8x128xf32>
    %cst_20 = arith.constant 0.000000e+00 : f32
    %24 = vector.broadcast %cst_20 : f32 to vector<8x128xf32>
    %25 = arith.maximumf %23, %24 : vector<8x128xf32>
    %c0_21 = arith.constant 0 : index
    %c0_22 = arith.constant 0 : index
    %26 = vector.load %arg6[%c0_21, %c0_22] : memref<128x128xf32, #tpu.memory_space<vmem>>, vector<128x128xf32>
    %cst_23 = arith.constant dense<0.000000e+00> : vector<8x128xf32>
    %27 = tpu.matmul %25, %26, %cst_23 {dimension_numbers = #tpu.dot_dimension_numbers<[1], [0], [0], [1], [0, 0, 1, 1], [], []>} : vector<8x128xf32>, vector<128x128xf32>, vector<8x128xf32> -> vector<8x128xf32>
    %c0_24 = arith.constant 0 : index
    %c0_25 = arith.constant 0 : index
    %28 = vector.load %arg7[%c0_24, %c0_25] : memref<1x128xf32, #tpu.memory_space<vmem>>, vector<1x128xf32>
    %29 = vector.broadcast %28 : vector<1x128xf32> to vector<8x128xf32>
    %30 = arith.addf %27, %29 : vector<8x128xf32>
    %c0_26 = arith.constant 0 : index
    %c0_27 = arith.constant 0 : index
    %31 = vector.load %arg8[%c0_26, %c0_27] : memref<8x128xf32, #tpu.memory_space<vmem>>, vector<8x128xf32>
    tpu.vector_store %arg8[%c0_26, %c0_27], %30 {strides = array<i32>} : memref<8x128xf32, #tpu.memory_space<vmem>>, vector<8x128xf32>,
    return
  }
  func.func @transform_0(%arg0: i32) -> (i32, i32) {
    %c0_i32 = arith.constant 0 : i32
    %c0_i32_0 = arith.constant 0 : i32
    return %arg0, %c0_i32 : i32, i32
  }
  func.func @transform_1(%arg0: i32) -> (i32, i32) {
    %c0_i32 = arith.constant 0 : i32
    %c0_i32_0 = arith.constant 0 : i32
    %c0_i32_1 = arith.constant 0 : i32
    return %c0_i32, %c0_i32_0 : i32, i32
  }
  func.func @transform_2(%arg0: i32) -> (i32, i32) {
    %c0_i32 = arith.constant 0 : i32
    %c0_i32_0 = arith.constant 0 : i32
    %c0_i32_1 = arith.constant 0 : i32
    return %c0_i32, %c0_i32_0 : i32, i32
  }
  func.func @transform_3(%arg0: i32) -> (i32, i32, i32) {
    %c0_i32 = arith.constant 0 : i32
    %c0_i32_0 = arith.constant 0 : i32
    %c0_i32_1 = arith.constant 0 : i32
    %c0_i32_2 = arith.constant 0 : i32
    return %c0_i32, %c0_i32_0, %c0_i32_1 : i32, i32, i32
  }
  func.func @transform_4(%arg0: i32) -> (i32, i32, i32) {
    %c0_i32 = arith.constant 0 : i32
    %c0_i32_0 = arith.constant 0 : i32
    %c0_i32_1 = arith.constant 0 : i32
    %c0_i32_2 = arith.constant 0 : i32
    return %c0_i32, %c0_i32_0, %c0_i32_1 : i32, i32, i32
  }
  func.func @transform_5(%arg0: i32) -> (i32, i32) {
    %c0_i32 = arith.constant 0 : i32
    %c0_i32_0 = arith.constant 0 : i32
    %c0_i32_1 = arith.constant 0 : i32
    return %c0_i32, %c0_i32_0 : i32, i32
  }
  func.func @transform_6(%arg0: i32) -> (i32, i32) {
    %c0_i32 = arith.constant 0 : i32
    %c0_i32_0 = arith.constant 0 : i32
    %c0_i32_1 = arith.constant 0 : i32
    return %c0_i32, %c0_i32_0 : i32, i32
  }
  func.func @transform_7(%arg0: i32) -> (i32, i32) {
    %c0_i32 = arith.constant 0 : i32
    %c0_i32_0 = arith.constant 0 : i32
    return %arg0, %c0_i32 : i32, i32
  }
}

module attributes {stable_mosaic.version = 11 : i64} {
  func.func @_mlp_kernel(%arg0: i32, %arg1: memref<8x128xf32, #tpu.memory_space<vmem>>, %arg2: memref<128x128xf32, #tpu.memory_space<vmem>>, %arg3: memref<1x128xf32, #tpu.memory_space<vmem>>, %arg4: memref<2x128x128xf32, #tpu.memory_space<vmem>>, %arg5: memref<2x1x128xf32, #tpu.memory_space<vmem>>, %arg6: memref<128x128xf32, #tpu.memory_space<vmem>>, %arg7: memref<1x128xf32, #tpu.memory_space<vmem>>, %arg8: memref<8x128xf32, #tpu.memory_space<vmem>>) attributes {dimension_semantics = [#tpu.dimension_semantics<parallel>], iteration_bounds = array<i64: 1>, scalar_prefetch = 0 : i64, scratch_operands = 0 : i64, tpu.core_type = #tpu.core_type<tc>, window_params = [{transform_indices = @transform_0, window_bounds = array<i64: 8, 128>}, {pipeline_mode = #tpu.pipeline_mode<synchronous>, transform_indices = @transform_1, window_bounds = array<i64: 128, 128>}, {pipeline_mode = #tpu.pipeline_mode<synchronous>, transform_indices = @transform_2, window_bounds = array<i64: 1, 128>}, {pipeline_mode = #tpu.pipeline_mode<synchronous>, transform_indices = @transform_3, window_bounds = array<i64: 2, 128, 128>}, {pipeline_mode = #tpu.pipeline_mode<synchronous>, transform_indices = @transform_4, window_bounds = array<i64: 2, 1, 128>}, {pipeline_mode = #tpu.pipeline_mode<synchronous>, transform_indices = @transform_5, window_bounds = array<i64: 128, 128>}, {pipeline_mode = #tpu.pipeline_mode<synchronous>, transform_indices = @transform_6, window_bounds = array<i64: 1, 128>}, {transform_indices = @transform_7, window_bounds = array<i64: 8, 128>}]} {
    %c0 = arith.constant 0 : index
    %c0_0 = arith.constant 0 : index
    %0 = vector.load %arg1[%c0, %c0_0] : memref<8x128xf32, #tpu.memory_space<vmem>>, vector<8x128xf32>
    %c0_1 = arith.constant 0 : index
    %c0_2 = arith.constant 0 : index
    %1 = vector.load %arg2[%c0_1, %c0_2] : memref<128x128xf32, #tpu.memory_space<vmem>>, vector<128x128xf32>
    %cst = arith.constant dense<0.000000e+00> : vector<8x128xf32>
    %2 = tpu.matmul %0, %1, %cst {dimension_numbers = #tpu.dot_dimension_numbers<[1], [0], [0], [1], [0, 0, 1, 1], [], []>} : vector<8x128xf32>, vector<128x128xf32>, vector<8x128xf32> -> vector<8x128xf32>
    %c0_3 = arith.constant 0 : index
    %c0_4 = arith.constant 0 : index
    %3 = vector.load %arg3[%c0_3, %c0_4] : memref<1x128xf32, #tpu.memory_space<vmem>>, vector<1x128xf32>
    %4 = vector.broadcast %3 : vector<1x128xf32> to vector<8x128xf32>
    %5 = arith.addf %2, %4 : vector<8x128xf32>
    %cst_5 = arith.constant 0.000000e+00 : f32
    %6 = vector.broadcast %cst_5 : f32 to vector<8x128xf32>
    %7 = arith.maximumf %5, %6 : vector<8x128xf32>
    %c0_6 = arith.constant 0 : index
    %c0_7 = arith.constant 0 : index
    %c0_8 = arith.constant 0 : index
    %8 = vector.load %arg4[%c0_6, %c0_7, %c0_8] : memref<2x128x128xf32, #tpu.memory_space<vmem>>, vector<1x128x128xf32>
    %9 = vector.shape_cast %8 : vector<1x128x128xf32> to vector<128x128xf32>
    %cst_9 = arith.constant dense<0.000000e+00> : vector<8x128xf32>
    %10 = tpu.matmul %7, %9, %cst_9 {dimension_numbers = #tpu.dot_dimension_numbers<[1], [0], [0], [1], [0, 0, 1, 1], [], []>} : vector<8x128xf32>, vector<128x128xf32>, vector<8x128xf32> -> vector<8x128xf32>
    %c0_10 = arith.constant 0 : index
    %c0_11 = arith.constant 0 : index
    %c0_12 = arith.constant 0 : index
    %11 = vector.load %arg5[%c0_10, %c0_11, %c0_12] : memref<2x1x128xf32, #tpu.memory_space<vmem>>, vector<1x1x128xf32>
    %12 = vector.shape_cast %11 : vector<1x1x128xf32> to vector<1x128xf32>
    %13 = vector.broadcast %12 : vector<1x128xf32> to vector<8x128xf32>
    %14 = arith.addf %10, %13 : vector<8x128xf32>
    %cst_13 = arith.constant 0.000000e+00 : f32
    %15 = vector.broadcast %cst_13 : f32 to vector<8x128xf32>
    %16 = arith.maximumf %14, %15 : vector<8x128xf32>
    %c1 = arith.constant 1 : index
    %c0_14 = arith.constant 0 : index
    %c0_15 = arith.constant 0 : index
    %17 = vector.load %arg4[%c1, %c0_14, %c0_15] : memref<2x128x128xf32, #tpu.memory_space<vmem>>, vector<1x128x128xf32>
    %18 = vector.shape_cast %17 : vector<1x128x128xf32> to vector<128x128xf32>
    %cst_16 = arith.constant dense<0.000000e+00> : vector<8x128xf32>
    %19 = tpu.matmul %16, %18, %cst_16 {dimension_numbers = #tpu.dot_dimension_numbers<[1], [0], [0], [1], [0, 0, 1, 1], [], []>} : vector<8x128xf32>, vector<128x128xf32>, vector<8x128xf32> -> vector<8x128xf32>
    %c1_17 = arith.constant 1 : index
    %c0_18 = arith.constant 0 : index
    %c0_19 = arith.constant 0 : index
    %20 = vector.load %arg5[%c1_17, %c0_18, %c0_19] : memref<2x1x128xf32, #tpu.memory_space<vmem>>, vector<1x1x128xf32>
    %21 = vector.shape_cast %20 : vector<1x1x128xf32> to vector<1x128xf32>
    %22 = vector.broadcast %21 : vector<1x128xf32> to vector<8x128xf32>
    %23 = arith.addf %19, %22 : vector<8x128xf32>
    %cst_20 = arith.constant 0.000000e+00 : f32
    %24 = vector.broadcast %cst_20 : f32 to vector<8x128xf32>
    %25 = arith.maximumf %23, %24 : vector<8x128xf32>
    %c0_21 = arith.constant 0 : index
    %c0_22 = arith.constant 0 : index
    %26 = vector.load %arg6[%c0_21, %c0_22] : memref<128x128xf32, #tpu.memory_space<vmem>>, vector<128x128xf32>
    %cst_23 = arith.constant dense<0.000000e+00> : vector<8x128xf32>
    %27 = tpu.matmul %25, %26, %cst_23 {dimension_numbers = #tpu.dot_dimension_numbers<[1], [0], [0], [1], [0, 0, 1, 1], [], []>} : vector<8x128xf32>, vector<128x128xf32>, vector<8x128xf32> -> vector<8x128xf32>
    %c0_24 = arith.constant 0 : index
    %c0_25 = arith.constant 0 : index
    %28 = vector.load %arg7[%c0_24, %c0_25] : memref<1x128xf32, #tpu.memory_space<vmem>>, vector<1x128xf32>
    %29 = vector.broadcast %28 : vector<1x128xf32> to vector<8x128xf32>
    %30 = arith.addf %27, %29 : vector<8x128xf32>
    %c0_26 = arith.constant 0 : index
    %c0_27 = arith.constant 0 : index
    %31 = vector.load %arg8[%c0_26, %c0_27] : memref<8x128xf32, #tpu.memory_space<vmem>>, vector<8x128xf32>
    tpu.vector_store %arg8[%c0_26, %c0_27], %30 {strides = array<i32>} : memref<8x128xf32, #tpu.memory_space<vmem>>, vector<8x128xf32>,
    return
  }
  func.func @transform_0(%arg0: i32) -> (i32, i32) {
    %c0_i32 = arith.constant 0 : i32
    %c0_i32_0 = arith.constant 0 : i32
    return %arg0, %c0_i32 : i32, i32
  }
  func.func @transform_1(%arg0: i32) -> (i32, i32) {
    %c0_i32 = arith.constant 0 : i32
    %c0_i32_0 = arith.constant 0 : i32
    %c0_i32_1 = arith.constant 0 : i32
    return %c0_i32, %c0_i32_0 : i32, i32
  }
  func.func @transform_2(%arg0: i32) -> (i32, i32) {
    %c0_i32 = arith.constant 0 : i32
    %c0_i32_0 = arith.constant 0 : i32
    %c0_i32_1 = arith.constant 0 : i32
    return %c0_i32, %c0_i32_0 : i32, i32
  }
  func.func @transform_3(%arg0: i32) -> (i32, i32, i32) {
    %c0_i32 = arith.constant 0 : i32
    %c0_i32_0 = arith.constant 0 : i32
    %c0_i32_1 = arith.constant 0 : i32
    %c0_i32_2 = arith.constant 0 : i32
    return %c0_i32, %c0_i32_0, %c0_i32_1 : i32, i32, i32
  }
  func.func @transform_4(%arg0: i32) -> (i32, i32, i32) {
    %c0_i32 = arith.constant 0 : i32
    %c0_i32_0 = arith.constant 0 : i32
    %c0_i32_1 = arith.constant 0 : i32
    %c0_i32_2 = arith.constant 0 : i32
    return %c0_i32, %c0_i32_0, %c0_i32_1 : i32, i32, i32
  }
  func.func @transform_5(%arg0: i32) -> (i32, i32) {
    %c0_i32 = arith.constant 0 : i32
    %c0_i32_0 = arith.constant 0 : i32
    %c0_i32_1 = arith.constant 0 : i32
    return %c0_i32, %c0_i32_0 : i32, i32
  }
  func.func @transform_6(%arg0: i32) -> (i32, i32) {
    %c0_i32 = arith.constant 0 : i32
    %c0_i32_0 = arith.constant 0 : i32
    %c0_i32_1 = arith.constant 0 : i32
    return %c0_i32, %c0_i32_0 : i32, i32
  }
  func.func @transform_7(%arg0: i32) -> (i32, i32) {
    %c0_i32 = arith.constant 0 : i32
    %c0_i32_0 = arith.constant 0 : i32
    return %arg0, %c0_i32 : i32, i32
  }
}

</mosaic_0001>

<bundles_post_ra>
// kernel: tpu_custom_call.1
= control target key start
LH: loop header
LB: loop body
LE: loop exit
PB: predicated region body
PF: predicated region fallthrough
CT: control target
= control target key end

     0   :  { %12 = vsyncpa [#allocation3], 0  ;;  %s1084_s0 = inlined_call_operand.hbm [shape: f32[8,128], index: 0, kind: input, shape index: {}]   ;;  %s1085_s1 = inlined_call_operand.hbm [shape: f32[128,128], index: 1, kind: input, shape index: {}]   ;;  %s1086_s2 = inlined_call_operand.vmem [shape: f32[1,128], index: 2, kind: input, shape index: {}]   ;;  %s1087_s3 = inlined_call_operand.hbm [shape: f32[2,128,128], index: 3, kind: input, shape index: {}]   ;;  %s1088_s4 = inlined_call_operand.vmem [shape: f32[2,1,128], index: 4, kind: input, shape index: {}]   ;;  %s1089_s5 = inlined_call_operand.hbm [shape: f32[128,128], index: 5, kind: input, shape index: {}]   ;;  %s1090_s6 = inlined_call_operand.vmem [shape: f32[1,128], index: 6, kind: input, shape index: {}]   ;;  %s1091_s7 = inlined_call_operand.hbm [shape: f32[8,128], index: 7, kind: output, shape index: {}]  }
   0x1   :  { %13 = vsyncpa [#allocation6], 0 }
   0x2   :  { %14 = vsyncpa [#allocation9], 0 }
   0x3   :  { %15 = vsyncpa [#allocation4], 0  ;;  %s913_s24 = smov [#allocation5]   ;;  %s795_s28 = scalar_lea.hbm %s1085_s1, 2048 }
   0x4   :  { %s31_s25 = sshll.u32 %s913_s24, 4  ;;  %p796_p0 = scmp.ne.s32.totalorder %s1085_s1, %s795_s28  ;;  %s32_s25 = int_to_ptr.vmem [resolvable:$true] %s31_s25 }
   0x5   :  { %p799_p1 = scmp.lt.u32.totalorder %s795_s28, %s1085_s1 }
   0x7   :  { %p801_p2 = pnand %p799_p1, %p796_p0 }
   0x9   :  { %804 = shalt.err (!%p801_p2)
}
   0xa   :  { %s805_s10 = scalar_lea.vmem %s32_s25, 2048  ;;  %p810_p4 = scmp.lt.s32.totalorder %s32_s25, %s32_s25 }
   0xb   :  { %p806_p3 = scmp.ne.s32.totalorder %s32_s25, %s805_s10  ;;  %p811_p5 = scmp.lt.s32.totalorder %s805_s10, %s805_s10 }
   0xd   :  { %p812_p6 = por %p811_p5, %p810_p4 }
   0xf   :  { %p813_p7 = pnand %p812_p6, %p806_p3 }
  0x11   :  { %816 = shalt.err (!%p813_p7)
}
  0x12   :  { %s914_s11 = smov 128   ;;  %s915_s12 = smov 8  }
  0x13   :  { %37 = dma.hbm_to_vmem [thread:$0]  %s1085_s1, 2048, %s32_s25, [#allocation6], %s914_s11, %s914_s11, %s915_s12  }
  0x14   :  { %s916_s15 = smov [#allocation2]   ;;  %s917_s17 = smov [#allocation7]  }
  0x15   :  { %s22_s16 = sshll.u32 %s916_s15, 4  ;;  %s45_s18 = sshll.u32 %s917_s17, 4  ;;  %s23_s16 = int_to_ptr.vmem [resolvable:$true] %s22_s16  ;;  %s46_s18 = int_to_ptr.vmem [resolvable:$true] %s45_s18 }
  0x16   :  { %s817_s21 = scalar_lea.hbm %s1084_s0, 128 }
  0x17   :  { %p818_p8 = scmp.ne.s32.totalorder %s1084_s0, %s817_s21  ;;  %p821_p9 = scmp.lt.u32.totalorder %s817_s21, %s1084_s0 }
  0x19   :  { %p823_p10 = pnand %p821_p9, %p818_p8 }
  0x1b   :  { %826 = shalt.err (!%p823_p10)
}
  0x1c   :  { %s827_s1 = scalar_lea.vmem %s23_s16, 128  ;;  %p832_p12 = scmp.lt.s32.totalorder %s23_s16, %s23_s16 }
  0x1d   :  { %p828_p11 = scmp.ne.s32.totalorder %s23_s16, %s827_s1  ;;  %p833_p13 = scmp.lt.s32.totalorder %s827_s1, %s827_s1 }
  0x1f   :  { %p834_p0 = por %p833_p13, %p832_p12 }
  0x21   :  { %p835_p1 = pnand %p834_p0, %p828_p11 }
  0x23   :  { %838 = shalt.err (!%p835_p1)
}
  0x24   :  { %25 = dma.hbm_to_vmem [thread:$0]  %s1084_s0, 128, %s23_s16, [#allocation3]  }
  0x25   :  { %s839_s30 = scalar_lea.hbm %s1087_s3, 4096 }
  0x26   :  { %p840_p2 = scmp.ne.s32.totalorder %s1087_s3, %s839_s30  ;;  %p843_p3 = scmp.lt.u32.totalorder %s839_s30, %s1087_s3 }
  0x28   :  { %p845_p4 = pnand %p843_p3, %p840_p2 }
  0x2a   :  { %848 = shalt.err (!%p845_p4)
}
  0x2b   :  { %s849_s14 = scalar_lea.vmem %s46_s18, 4096  ;;  %p854_p6 = scmp.lt.s32.totalorder %s46_s18, %s46_s18 }
  0x2c   :  { %p850_p5 = scmp.ne.s32.totalorder %s46_s18, %s849_s14  ;;  %p855_p7 = scmp.lt.s32.totalorder %s849_s14, %s849_s14 }
  0x2e   :  { %p856_p8 = por %p855_p7, %p854_p6 }
  0x30   :  { %p857_p9 = pnand %p856_p8, %p850_p5 }
  0x32   :  { %860 = shalt.err (!%p857_p9)
}
  0x33   :  { %51 = dma.hbm_to_vmem [thread:$0]  %s1087_s3, 4096, %s46_s18, [#allocation6], %s914_s11, %s914_s11, %s915_s12  }
  0x34   :  { %s918_s16 = smov [#allocation8]   ;;  %s861_s21 = scalar_lea.hbm %s1089_s5, 2048 }
  0x35   :  { %s59_s17 = sshll.u32 %s918_s16, 4  ;;  %p862_p10 = scmp.ne.s32.totalorder %s1089_s5, %s861_s21  ;;  %s60_s17 = int_to_ptr.vmem [resolvable:$true] %s59_s17 }
  0x36   :  { %p865_p11 = scmp.lt.u32.totalorder %s861_s21, %s1089_s5 }
  0x38   :  { %p867_p12 = pnand %p865_p11, %p862_p10 }
  0x3a   :  { %870 = shalt.err (!%p867_p12)
}
  0x3b   :  { %s871_s1 = scalar_lea.vmem %s60_s17, 2048  ;;  %p876_p0 = scmp.lt.s32.totalorder %s60_s17, %s60_s17 }
  0x3c   :  { %p872_p13 = scmp.ne.s32.totalorder %s60_s17, %s871_s1  ;;  %p877_p1 = scmp.lt.s32.totalorder %s871_s1, %s871_s1 }
  0x3e   :  { %p878_p2 = por %p877_p1, %p876_p0 }
  0x40   :  { %p879_p3 = pnand %p878_p2, %p872_p13 }
  0x42   :  { %882 = shalt.err (!%p879_p3)
}
  0x43   :  { %65 = dma.hbm_to_vmem [thread:$0]  %s1089_s5, 2048, %s60_s17, [#allocation9], %s914_s11, %s914_s11, %s915_s12  }
  0x44   :  { %905 = dma.done.wait [#allocation3], 128  }
  0x45   :  { %906 = vsyncadd [#allocation3], 4294967168 }
  0x46   :  { %907 = dma.done.wait [#allocation6], 6144  }
  0x47   :  { %908 = vsyncadd [#allocation6], 4294961152 }
  0x48   :  { %909 = dma.done.wait [#allocation9], 2048  }
  0x49   :  { %910 = vsyncadd [#allocation9], 4294965248  ;;  %v919_v0 = vmov 0.0|0.0   ;;  %vm920_vm0 = vmmov 0   ;;  %v921_v1 = vmov 0.0   ;;  %v81_v2 = vld [vmem:[#allocation5] sm:$0xff] }
  0x4a   :  { %689 = vmatprep.subr.bf16.mxu0 %v919_v0  ;;  %581 = vmatprep.mubr.msk.f32.mxu0 %vm920_vm0, %v921_v1  ;;  %v82_v3 = vld [vmem:[#allocation5 + $0x8] sm:$0xff]  ;;  %v83_v4 = vld [vmem:[#allocation5 + $0x10] sm:$0xff]  ;;  %v84_v6 = vld [vmem:[#allocation5 + $0x18] sm:$0xff]  ;;  %s922_s30 = smov [#allocation10]  }
  0x4b   :  { %713 = vmatprep.subr.bf16.mxu1 %v919_v0  ;;  %616 = vmatprep.mubr.msk.f32.mxu1 %vm920_vm0, %v921_v1  ;;  %v690_v5 = vpack.c.bf16 %v82_v3, %v81_v2  ;;  %v693_v7 = vpack.c.bf16 %v84_v6, %v83_v4  ;;  %v85_v8 = vld [vmem:[#allocation5 + $0x20] sm:$0xff]  ;;  %v86_v9 = vld [vmem:[#allocation5 + $0x28] sm:$0xff]  ;;  %v177_v12 = vld [vmem:[#allocation7 + $0x10] sm:$0xff]  ;;  %s465_s8 = sshll.u32 %s922_s30, 4  ;;  %s466_s8 = int_to_ptr.vmem [resolvable:$true] %s465_s8 }
  0x4c   :  { %v175_v10 = vld [vmem:[#allocation7] sm:$0xff]  ;;  %v176_v11 = vld [vmem:[#allocation7 + $0x8] sm:$0xff]  ;;  %v178_v13 = vld [vmem:[#allocation7 + $0x18] sm:$0xff]  ;;  %v696_v14 = vpack.c.bf16 %v86_v9, %v85_v8  ;;  %s883_s9 = scalar_lea.vmem %s466_s8, 128  ;;  %p888_p5 = scmp.lt.s32.totalorder %s466_s8, %s466_s8 }
  0x4d   :  { %691 = vmatpush3.bf16.msra.mxu0 %v690_v5  ;;  %v714_v15 = vpack.c.bf16 %v176_v11, %v175_v10  ;;  %v87_v16 = vld [vmem:[#allocation5 + $0x30] sm:$0xff]  ;;  %v88_v17 = vld [vmem:[#allocation5 + $0x38] sm:$0xff]  ;;  %v717_v18 = vpack.c.bf16 %v178_v13, %v177_v12  ;;  %v179_v19 = vld [vmem:[#allocation7 + $0x20] sm:$0xff]  ;;  %p884_p4 = scmp.ne.s32.totalorder %s466_s8, %s883_s9  ;;  %p889_p6 = scmp.lt.s32.totalorder %s883_s9, %s883_s9 }
  0x4e   :  { %692 = vmatprep.subr.bf16.mxu0 %v919_v0  ;;  %v180_v20 = vld [vmem:[#allocation7 + $0x28] sm:$0xff]  ;;  %v699_v21 = vpack.c.bf16 %v88_v17, %v87_v16  ;;  %v89_v22 = vld [vmem:[#allocation5 + $0x40] sm:$0xff]  ;;  %v181_v25 = vld [vmem:[#allocation7 + $0x30] sm:$0xff] }
  0x4f   :  { %715 = vmatpush3.bf16.msra.mxu1 %v714_v15  ;;  %v90_v23 = vld [vmem:[#allocation5 + $0x48] sm:$0xff]  ;;  %v720_v24 = vpack.c.bf16 %v180_v20, %v179_v19  ;;  %v182_v26 = vld [vmem:[#allocation7 + $0x38] sm:$0xff]  ;;  %v91_v28 = vld [vmem:[#allocation5 + $0x50] sm:$0xff]  ;;  %p890_p7 = por %p889_p6, %p888_p5 }
  0x50   :  { %716 = vmatprep.subr.bf16.mxu1 %v919_v0  ;;  %v702_v27 = vpack.c.bf16 %v90_v23, %v89_v22  ;;  %v92_v29 = vld [vmem:[#allocation5 + $0x58] sm:$0xff]  ;;  %v723_v30 = vpack.c.bf16 %v182_v26, %v181_v25  ;;  %v183_v31 = vld [vmem:[#allocation7 + $0x40] sm:$0xff]  ;;  %v184_v32 = vld [vmem:[#allocation7 + $0x48] sm:$0xff] }
  0x51   :  { %694 = vmatpush3.bf16.msra.mxu0 %v693_v7  ;;  %v705_v33 = vpack.c.bf16 %v92_v29, %v91_v28  ;;  %v93_v34 = vld [vmem:[#allocation5 + $0x60] sm:$0xff]  ;;  %v94_v35 = vld [vmem:[#allocation5 + $0x68] sm:$0xff]  ;;  %v726_v36 = vpack.c.bf16 %v184_v32, %v183_v31  ;;  %v185_v37 = vld [vmem:[#allocation7 + $0x50] sm:$0xff]  ;;  %p891_p8 = pnand %p890_p7, %p884_p4 }
  0x52   :  { %695 = vmatprep.subr.bf16.mxu0 %v919_v0  ;;  %v186_v38 = vld [vmem:[#allocation7 + $0x58] sm:$0xff]  ;;  %v708_v39 = vpack.c.bf16 %v94_v35, %v93_v34  ;;  %v95_v40 = vld [vmem:[#allocation5 + $0x70] sm:$0xff]  ;;  %v187_v43 = vld [vmem:[#allocation7 + $0x60] sm:$0xff] }
  0x53   :  { %718 = vmatpush3.bf16.msra.mxu1 %v717_v18  ;;  %v96_v41 = vld [vmem:[#allocation5 + $0x78] sm:$0xff]  ;;  %v729_v42 = vpack.c.bf16 %v186_v38, %v185_v37  ;;  %v188_v44 = vld [vmem:[#allocation7 + $0x68] sm:$0xff]  ;;  %v189_v48 = vld [vmem:[#allocation7 + $0x70] sm:$0xff] }
  0x54   :  { %719 = vmatprep.subr.bf16.mxu1 %v919_v0  ;;  %v711_v45 = vpack.c.bf16 %v96_v41, %v95_v40  ;;  %v732_v46 = vpack.c.bf16 %v188_v44, %v187_v43  ;;  %v80_v47 = vld [vmem:[#allocation2] sm:$0xff]  ;;  %v270_v51 = vld [vmem:[#allocation7 + $0x80] sm:$0xff]  ;;  %v271_v52 = vld [vmem:[#allocation7 + $0x88] sm:$0xff] }
  0x55   :  { %697 = vmatpush3.bf16.msra.mxu0 %v696_v14  ;;  %v190_v49 = vld [vmem:[#allocation7 + $0x78] sm:$0xff]  ;;  %v272_v53 = vld [vmem:[#allocation7 + $0x90] sm:$0xff]  ;;  %v738_v54 = vpack.c.bf16 %v271_v52, %v270_v51  ;;  %v274_v57 = vld [vmem:[#allocation7 + $0xa0] sm:$0xff] }
  0x56   :  { %698 = vmatprep.subr.bf16.mxu0 %v919_v0  ;;  %v735_v50 = vpack.c.bf16 %v190_v49, %v189_v48  ;;  %v273_v55 = vld [vmem:[#allocation7 + $0x98] sm:$0xff]  ;;  %v275_v58 = vld [vmem:[#allocation7 + $0xa8] sm:$0xff]  ;;  %v276_v60 = vld [vmem:[#allocation7 + $0xb0] sm:$0xff] }
  0x57   :  { %721 = vmatpush3.bf16.msra.mxu1 %v720_v24  ;;  %v741_v56 = vpack.c.bf16 %v273_v55, %v272_v53  ;;  %v744_v59 = vpack.c.bf16 %v275_v58, %v274_v57  ;;  %v277_v61 = vld [vmem:[#allocation7 + $0xb8] sm:$0xff]  ;;  %v278_v63 = vld [vmem:[#allocation7 + $0xc0] sm:$0xff]  ;;  %v279_v2 = vld [vmem:[#allocation7 + $0xc8] sm:$0xff] }
  0x58   :  { %722 = vmatprep.subr.bf16.mxu1 %v919_v0  ;;  %v747_v62 = vpack.c.bf16 %v277_v61, %v276_v60  ;;  %v750_v3 = vpack.c.bf16 %v279_v2, %v278_v63  ;;  %v280_v4 = vld [vmem:[#allocation7 + $0xd0] sm:$0xff]  ;;  %v281_v5 = vld [vmem:[#allocation7 + $0xd8] sm:$0xff]  ;;  %v282_v7 = vld [vmem:[#allocation7 + $0xe0] sm:$0xff] }
  0x59   :  { %700 = vmatpush3.bf16.msra.mxu0 %v699_v21  ;;  %v753_v6 = vpack.c.bf16 %v281_v5, %v280_v4  ;;  %v283_v8 = vld [vmem:[#allocation7 + $0xe8] sm:$0xff]  ;;  %v476_v10 = vld [vmem:[%s1086_s2] ss:$0 sm:$0xff]  ;;  %v284_v15 = vld [vmem:[#allocation7 + $0xf0] sm:$0xff] }
  0x5a   :  { %701 = vmatprep.subr.bf16.mxu0 %v919_v0  ;;  %v756_v9 = vpack.c.bf16 %v283_v8, %v282_v7  ;;  %v285_v16 = vld [vmem:[#allocation7 + $0xf8] sm:$0xff]  ;;  %v365_v18 = vld [vmem:[#allocation8] sm:$0xff]  ;;  %v366_v19 = vld [vmem:[#allocation8 + $0x8] sm:$0xff] }
  0x5b   :  { %724 = vmatpush3.bf16.msra.mxu1 %v723_v30  ;;  %v759_v17 = vpack.c.bf16 %v285_v16, %v284_v15  ;;  %v367_v20 = vld [vmem:[#allocation8 + $0x10] sm:$0xff]  ;;  %v762_v21 = vpack.c.bf16 %v366_v19, %v365_v18  ;;  %v368_v22 = vld [vmem:[#allocation8 + $0x18] sm:$0xff]  ;;  %v369_v24 = vld [vmem:[#allocation8 + $0x20] sm:$0xff] }
  0x5c   :  { %725 = vmatprep.subr.bf16.mxu1 %v919_v0  ;;  %v765_v23 = vpack.c.bf16 %v368_v22, %v367_v20  ;;  %v370_v25 = vld [vmem:[#allocation8 + $0x28] sm:$0xff]  ;;  %v373_v29 = vld [vmem:[#allocation8 + $0x40] sm:$0xff]  ;;  %v375_v32 = vld [vmem:[#allocation8 + $0x50] sm:$0xff] }
  0x5d   :  { %703 = vmatpush3.bf16.msra.mxu0 %v702_v27  ;;  %v768_v26 = vpack.c.bf16 %v370_v25, %v369_v24  ;;  %v372_v27 = vld [vmem:[#allocation8 + $0x38] sm:$0xff]  ;;  %v374_v30 = vld [vmem:[#allocation8 + $0x48] sm:$0xff]  ;;  %v377_v35 = vld [vmem:[#allocation8 + $0x60] sm:$0xff] }
  0x5e   :  { %704 = vmatprep.subr.bf16.mxu0 %v919_v0  ;;  %v774_v31 = vpack.c.bf16 %v374_v30, %v373_v29  ;;  %v477_v38 = vld [vmem:[%s1088_s4] ss:$0 sm:$0xff]  ;;  %v379_v43 = vld [vmem:[#allocation8 + $0x70] sm:$0xff] }
  0x5f   :  { %727 = vmatpush3.bf16.msra.mxu1 %v726_v36  ;;  %v378_v36 = vld [vmem:[#allocation8 + $0x68] sm:$0xff]  ;;  %v380_v44 = vld [vmem:[#allocation8 + $0x78] sm:$0xff] }
  0x60   :  { %728 = vmatprep.subr.bf16.mxu1 %v919_v0  ;;  %v780_v37 = vpack.c.bf16 %v378_v36, %v377_v35 }
  0x61   :  { %706 = vmatpush3.bf16.msra.mxu0 %v705_v33  ;;  %v376_v33 = vld [vmem:[#allocation8 + $0x58] sm:$0xff] }
  0x62   :  { %707 = vmatprep.subr.bf16.mxu0 %v919_v0  ;;  %v777_v34 = vpack.c.bf16 %v376_v33, %v375_v32 }
  0x63   :  { %730 = vmatpush3.bf16.msra.mxu1 %v729_v42 }
  0x64   :  { %731 = vmatprep.subr.bf16.mxu1 %v919_v0 }
  0x65   :  { %709 = vmatpush3.bf16.msra.mxu0 %v708_v39 }
  0x66   :  { %710 = vmatprep.subr.bf16.mxu0 %v919_v0 }
  0x67   :  { %733 = vmatpush3.bf16.msra.mxu1 %v732_v46  ;;  %v479_v46 = vld [vmem:[%s1088_s4 + $0x1] ss:$0 sm:$0xff] }
  0x68   :  { %734 = vmatprep.subr.bf16.mxu1 %v919_v0 }
  0x69   :  { %712 = vmatpush3.bf16.msra.mxu0 %v711_v45  ;;  %v783_v45 = vpack.c.bf16 %v380_v44, %v379_v43 }
  0x6a   :  { %737 = vmatprep.subr.bf16.mxu0 %v919_v0 }
  0x6b   :  { %736 = vmatpush3.bf16.msra.mxu1 %v735_v50  ;;  %v480_v50 = vld [vmem:[%s1090_s6] ss:$0 sm:$0xff] }
  0x6c   :  { %582 = vmatmul.mubr.f32.vlgmr.msra.gmra.mrb[0].mxu0 %v80_v47  ;;  %761 = vmatprep.subr.bf16.mxu1 %v919_v0 }
  0x6d   :  { %651 = vmatprep.mubr.msk.f32.mxu0 %vm920_vm0, %v921_v1  ;;  %739 = vmatpush3.bf16.msra.mxu0 %v738_v54 }
  0x6e   :  { %740 = vmatprep.subr.bf16.mxu0 %v919_v0 }
  0x71   :  { %742 = vmatpush3.bf16.msra.mxu0 %v741_v56 }
  0x72   :  { %743 = vmatprep.subr.bf16.mxu0 %v919_v0 }
  0x75   :  { %745 = vmatpush3.bf16.msra.mxu0 %v744_v59 }
  0x76   :  { %746 = vmatprep.subr.bf16.mxu0 %v919_v0 }
  0x79   :  { %748 = vmatpush3.bf16.msra.mxu0 %v747_v62 }
  0x7a   :  { %749 = vmatprep.subr.bf16.mxu0 %v919_v0 }
  0x7d   :  { %751 = vmatpush3.bf16.msra.mxu0 %v750_v3 }
  0x7e   :  { %752 = vmatprep.subr.bf16.mxu0 %v919_v0 }
  0x81   :  { %754 = vmatpush3.bf16.msra.mxu0 %v753_v6 }
  0x82   :  { %755 = vmatprep.subr.bf16.mxu0 %v919_v0 }
  0x85   :  { %757 = vmatpush3.bf16.msra.mxu0 %v756_v9 }
  0x86   :  { %758 = vmatprep.subr.bf16.mxu0 %v919_v0 }
  0x89   :  { %760 = vmatpush3.bf16.msra.mxu0 %v759_v17 }
 0x13f   :  { %v170_v11 = vpop.f32.mrb[0].mxu0 }
 0x140   :  { %v171_v12 = vadd.f32 %v476_v10, %v170_v11  ;;  %v583_v13 = vpop.f32.mrb[1].mxu0 }
 0x142   :  { %v174_v14 = vmax.f32 %v171_v12, 0.0 }
 0x144   :  { %617 = vmatmul.mubr.f32.vlgmr.msra.gmra.mrb[0].mxu1 %v174_v14 }
 0x145   :  { %686 = vmatprep.mubr.msk.f32.mxu1 %vm920_vm0, %v921_v1  ;;  %763 = vmatpush3.bf16.msra.mxu1 %v762_v21  ;;  %v371_v1 = vld [vmem:[#allocation8 + $0x30] sm:$0xff] }
 0x146   :  { %764 = vmatprep.subr.bf16.mxu1 %v919_v0  ;;  %v771_v28 = vpack.c.bf16 %v372_v27, %v371_v1 }
 0x149   :  { %766 = vmatpush3.bf16.msra.mxu1 %v765_v23 }
 0x14a   :  { %767 = vmatprep.subr.bf16.mxu1 %v919_v0 }
 0x14d   :  { %769 = vmatpush3.bf16.msra.mxu1 %v768_v26 }
 0x14e   :  { %770 = vmatprep.subr.bf16.mxu1 %v919_v0 }
 0x151   :  { %772 = vmatpush3.bf16.msra.mxu1 %v771_v28 }
 0x152   :  { %773 = vmatprep.subr.bf16.mxu1 %v919_v0 }
 0x155   :  { %775 = vmatpush3.bf16.msra.mxu1 %v774_v31 }
 0x156   :  { %776 = vmatprep.subr.bf16.mxu1 %v919_v0 }
 0x159   :  { %778 = vmatpush3.bf16.msra.mxu1 %v777_v34 }
 0x15a   :  { %779 = vmatprep.subr.bf16.mxu1 %v919_v0 }
 0x15d   :  { %781 = vmatpush3.bf16.msra.mxu1 %v780_v37 }
 0x15e   :  { %782 = vmatprep.subr.bf16.mxu1 %v919_v0 }
 0x161   :  { %784 = vmatpush3.bf16.msra.mxu1 %v783_v45 }
 0x217   :  { %v264_v39 = vpop.f32.mrb[0].mxu1 }
 0x218   :  { %v265_v40 = vadd.f32 %v477_v38, %v264_v39  ;;  %v618_v41 = vpop.f32.mrb[1].mxu1 }
 0x21a   :  { %v268_v42 = vmax.f32 %v265_v40, 0.0 }
 0x21c   :  { %652 = vmatmul.mubr.f32.vlgmr.msra.gmra.mrb[2].mxu0 %v268_v42 }
 0x2ef   :  { %v360_v47 = vpop.f32.mrb[2].mxu0 }
 0x2f0   :  { %v361_v48 = vadd.f32 %v479_v46, %v360_v47  ;;  %v653_v0 = vpop.f32.mrb[3].mxu0 }
 0x2f2   :  { %v364_v49 = vmax.f32 %v361_v48, 0.0 }
 0x2f4   :  { %687 = vmatmul.mubr.f32.vlgmr.msra.gmra.mrb[2].mxu1 %v364_v49 }
 0x3c7   :  { %v454_v51 = vpop.f32.mrb[2].mxu1 }
 0x3c8   :  { %v455_v52 = vadd.f32 %v480_v50, %v454_v51  ;;  %v688_v53 = vpop.f32.mrb[3].mxu1 }
 0x3ca   :  { %458 = vst [vmem:[#allocation10] sm:$0xff] %v455_v52 }
 0x3cb   :  { %894 = shalt.err (!%p891_p8)
}
 0x3cc   :  { %s895_s13 = scalar_lea.hbm %s1091_s7, 128 }
 0x3cd   :  { %p896_p9 = scmp.ne.s32.totalorder %s1091_s7, %s895_s13  ;;  %p899_p10 = scmp.lt.u32.totalorder %s895_s13, %s1091_s7 }
 0x3cf   :  { %p901_p11 = pnand %p899_p10, %p896_p9 }
 0x3d1   :  { %904 = shalt.err (!%p901_p11)
}
 0x3d2   :  { %468 = dma.vmem_to_hbm [thread:$0]  %s466_s8, 128, %s1091_s7, [#allocation4]  }
 0x3d3   :  { %911 = dma.done.wait [#allocation4], 128  }
 0x3d4   :  { %912 = vsyncadd [#allocation4], 4294967168 }
 0x3d5   :  { %472 = vsyncpa [#allocation3], 1 }
 0x3d6   :  { %473 = vsyncpa [#allocation6], 1 }
 0x3d7   :  { %474 = vsyncpa [#allocation9], 1 }
 0x3d8   :  { %475 = vsyncpa [#allocation4], 1 }

// kernel: tpu_custom_call.1
= control target key start
LH: loop header
LB: loop body
LE: loop exit
PB: predicated region body
PF: predicated region fallthrough
CT: control target
= control target key end

     0   :  { %12 = vsyncpa [#allocation3], 0  ;;  %s1084_s0 = inlined_call_operand.hbm [shape: f32[8,128], index: 0, kind: input, shape index: {}]   ;;  %s1085_s1 = inlined_call_operand.hbm [shape: f32[128,128], index: 1, kind: input, shape index: {}]   ;;  %s1086_s2 = inlined_call_operand.vmem [shape: f32[1,128], index: 2, kind: input, shape index: {}]   ;;  %s1087_s3 = inlined_call_operand.hbm [shape: f32[2,128,128], index: 3, kind: input, shape index: {}]   ;;  %s1088_s4 = inlined_call_operand.vmem [shape: f32[2,1,128], index: 4, kind: input, shape index: {}]   ;;  %s1089_s5 = inlined_call_operand.hbm [shape: f32[128,128], index: 5, kind: input, shape index: {}]   ;;  %s1090_s6 = inlined_call_operand.vmem [shape: f32[1,128], index: 6, kind: input, shape index: {}]   ;;  %s1091_s7 = inlined_call_operand.hbm [shape: f32[8,128], index: 7, kind: output, shape index: {}]  }
   0x1   :  { %13 = vsyncpa [#allocation6], 0 }
   0x2   :  { %14 = vsyncpa [#allocation9], 0 }
   0x3   :  { %15 = vsyncpa [#allocation4], 0  ;;  %s913_s24 = smov [#allocation5]   ;;  %s795_s28 = scalar_lea.hbm %s1085_s1, 2048 }
   0x4   :  { %s31_s25 = sshll.u32 %s913_s24, 4  ;;  %p796_p0 = scmp.ne.s32.totalorder %s1085_s1, %s795_s28  ;;  %s32_s25 = int_to_ptr.vmem [resolvable:$true] %s31_s25 }
   0x5   :  { %p799_p1 = scmp.lt.u32.totalorder %s795_s28, %s1085_s1 }
   0x7   :  { %p801_p2 = pnand %p799_p1, %p796_p0 }
   0x9   :  { %804 = shalt.err (!%p801_p2)
}
   0xa   :  { %s805_s10 = scalar_lea.vmem %s32_s25, 2048  ;;  %p810_p4 = scmp.lt.s32.totalorder %s32_s25, %s32_s25 }
   0xb   :  { %p806_p3 = scmp.ne.s32.totalorder %s32_s25, %s805_s10  ;;  %p811_p5 = scmp.lt.s32.totalorder %s805_s10, %s805_s10 }
   0xd   :  { %p812_p6 = por %p811_p5, %p810_p4 }
   0xf   :  { %p813_p7 = pnand %p812_p6, %p806_p3 }
  0x11   :  { %816 = shalt.err (!%p813_p7)
}
  0x12   :  { %s914_s11 = smov 128   ;;  %s915_s12 = smov 8  }
  0x13   :  { %37 = dma.hbm_to_vmem [thread:$0]  %s1085_s1, 2048, %s32_s25, [#allocation6], %s914_s11, %s914_s11, %s915_s12  }
  0x14   :  { %s916_s15 = smov [#allocation2]   ;;  %s917_s17 = smov [#allocation7]  }
  0x15   :  { %s22_s16 = sshll.u32 %s916_s15, 4  ;;  %s45_s18 = sshll.u32 %s917_s17, 4  ;;  %s23_s16 = int_to_ptr.vmem [resolvable:$true] %s22_s16  ;;  %s46_s18 = int_to_ptr.vmem [resolvable:$true] %s45_s18 }
  0x16   :  { %s817_s21 = scalar_lea.hbm %s1084_s0, 128 }
  0x17   :  { %p818_p8 = scmp.ne.s32.totalorder %s1084_s0, %s817_s21  ;;  %p821_p9 = scmp.lt.u32.totalorder %s817_s21, %s1084_s0 }
  0x19   :  { %p823_p10 = pnand %p821_p9, %p818_p8 }
  0x1b   :  { %826 = shalt.err (!%p823_p10)
}
  0x1c   :  { %s827_s1 = scalar_lea.vmem %s23_s16, 128  ;;  %p832_p12 = scmp.lt.s32.totalorder %s23_s16, %s23_s16 }
  0x1d   :  { %p828_p11 = scmp.ne.s32.totalorder %s23_s16, %s827_s1  ;;  %p833_p13 = scmp.lt.s32.totalorder %s827_s1, %s827_s1 }
  0x1f   :  { %p834_p0 = por %p833_p13, %p832_p12 }
  0x21   :  { %p835_p1 = pnand %p834_p0, %p828_p11 }
  0x23   :  { %838 = shalt.err (!%p835_p1)
}
  0x24   :  { %25 = dma.hbm_to_vmem [thread:$0]  %s1084_s0, 128, %s23_s16, [#allocation3]  }
  0x25   :  { %s839_s30 = scalar_lea.hbm %s1087_s3, 4096 }
  0x26   :  { %p840_p2 = scmp.ne.s32.totalorder %s1087_s3, %s839_s30  ;;  %p843_p3 = scmp.lt.u32.totalorder %s839_s30, %s1087_s3 }
  0x28   :  { %p845_p4 = pnand %p843_p3, %p840_p2 }
  0x2a   :  { %848 = shalt.err (!%p845_p4)
}
  0x2b   :  { %s849_s14 = scalar_lea.vmem %s46_s18, 4096  ;;  %p854_p6 = scmp.lt.s32.totalorder %s46_s18, %s46_s18 }
  0x2c   :  { %p850_p5 = scmp.ne.s32.totalorder %s46_s18, %s849_s14  ;;  %p855_p7 = scmp.lt.s32.totalorder %s849_s14, %s849_s14 }
  0x2e   :  { %p856_p8 = por %p855_p7, %p854_p6 }
  0x30   :  { %p857_p9 = pnand %p856_p8, %p850_p5 }
  0x32   :  { %860 = shalt.err (!%p857_p9)
}
  0x33   :  { %51 = dma.hbm_to_vmem [thread:$0]  %s1087_s3, 4096, %s46_s18, [#allocation6], %s914_s11, %s914_s11, %s915_s12  }
  0x34   :  { %s918_s16 = smov [#allocation8]   ;;  %s861_s21 = scalar_lea.hbm %s1089_s5, 2048 }
  0x35   :  { %s59_s17 = sshll.u32 %s918_s16, 4  ;;  %p862_p10 = scmp.ne.s32.totalorder %s1089_s5, %s861_s21  ;;  %s60_s17 = int_to_ptr.vmem [resolvable:$true] %s59_s17 }
  0x36   :  { %p865_p11 = scmp.lt.u32.totalorder %s861_s21, %s1089_s5 }
  0x38   :  { %p867_p12 = pnand %p865_p11, %p862_p10 }
  0x3a   :  { %870 = shalt.err (!%p867_p12)
}
  0x3b   :  { %s871_s1 = scalar_lea.vmem %s60_s17, 2048  ;;  %p876_p0 = scmp.lt.s32.totalorder %s60_s17, %s60_s17 }
  0x3c   :  { %p872_p13 = scmp.ne.s32.totalorder %s60_s17, %s871_s1  ;;  %p877_p1 = scmp.lt.s32.totalorder %s871_s1, %s871_s1 }
  0x3e   :  { %p878_p2 = por %p877_p1, %p876_p0 }
  0x40   :  { %p879_p3 = pnand %p878_p2, %p872_p13 }
  0x42   :  { %882 = shalt.err (!%p879_p3)
}
  0x43   :  { %65 = dma.hbm_to_vmem [thread:$0]  %s1089_s5, 2048, %s60_s17, [#allocation9], %s914_s11, %s914_s11, %s915_s12  }
  0x44   :  { %905 = dma.done.wait [#allocation3], 128  }
  0x45   :  { %906 = vsyncadd [#allocation3], 4294967168 }
  0x46   :  { %907 = dma.done.wait [#allocation6], 6144  }
  0x47   :  { %908 = vsyncadd [#allocation6], 4294961152 }
  0x48   :  { %909 = dma.done.wait [#allocation9], 2048  }
  0x49   :  { %910 = vsyncadd [#allocation9], 4294965248  ;;  %v919_v0 = vmov 0.0|0.0   ;;  %vm920_vm0 = vmmov 0   ;;  %v921_v1 = vmov 0.0   ;;  %v81_v2 = vld [vmem:[#allocation5] sm:$0xff] }
  0x4a   :  { %689 = vmatprep.subr.bf16.mxu0 %v919_v0  ;;  %581 = vmatprep.mubr.msk.f32.mxu0 %vm920_vm0, %v921_v1  ;;  %v82_v3 = vld [vmem:[#allocation5 + $0x8] sm:$0xff]  ;;  %v83_v4 = vld [vmem:[#allocation5 + $0x10] sm:$0xff]  ;;  %v84_v6 = vld [vmem:[#allocation5 + $0x18] sm:$0xff]  ;;  %s922_s30 = smov [#allocation10]  }
  0x4b   :  { %713 = vmatprep.subr.bf16.mxu1 %v919_v0  ;;  %616 = vmatprep.mubr.msk.f32.mxu1 %vm920_vm0, %v921_v1  ;;  %v690_v5 = vpack.c.bf16 %v82_v3, %v81_v2  ;;  %v693_v7 = vpack.c.bf16 %v84_v6, %v83_v4  ;;  %v85_v8 = vld [vmem:[#allocation5 + $0x20] sm:$0xff]  ;;  %v86_v9 = vld [vmem:[#allocation5 + $0x28] sm:$0xff]  ;;  %v177_v12 = vld [vmem:[#allocation7 + $0x10] sm:$0xff]  ;;  %s465_s8 = sshll.u32 %s922_s30, 4  ;;  %s466_s8 = int_to_ptr.vmem [resolvable:$true] %s465_s8 }
  0x4c   :  { %v175_v10 = vld [vmem:[#allocation7] sm:$0xff]  ;;  %v176_v11 = vld [vmem:[#allocation7 + $0x8] sm:$0xff]  ;;  %v178_v13 = vld [vmem:[#allocation7 + $0x18] sm:$0xff]  ;;  %v696_v14 = vpack.c.bf16 %v86_v9, %v85_v8  ;;  %s883_s9 = scalar_lea.vmem %s466_s8, 128  ;;  %p888_p5 = scmp.lt.s32.totalorder %s466_s8, %s466_s8 }
  0x4d   :  { %691 = vmatpush3.bf16.msra.mxu0 %v690_v5  ;;  %v714_v15 = vpack.c.bf16 %v176_v11, %v175_v10  ;;  %v87_v16 = vld [vmem:[#allocation5 + $0x30] sm:$0xff]  ;;  %v88_v17 = vld [vmem:[#allocation5 + $0x38] sm:$0xff]  ;;  %v717_v18 = vpack.c.bf16 %v178_v13, %v177_v12  ;;  %v179_v19 = vld [vmem:[#allocation7 + $0x20] sm:$0xff]  ;;  %p884_p4 = scmp.ne.s32.totalorder %s466_s8, %s883_s9  ;;  %p889_p6 = scmp.lt.s32.totalorder %s883_s9, %s883_s9 }
  0x4e   :  { %692 = vmatprep.subr.bf16.mxu0 %v919_v0  ;;  %v180_v20 = vld [vmem:[#allocation7 + $0x28] sm:$0xff]  ;;  %v699_v21 = vpack.c.bf16 %v88_v17, %v87_v16  ;;  %v89_v22 = vld [vmem:[#allocation5 + $0x40] sm:$0xff]  ;;  %v181_v25 = vld [vmem:[#allocation7 + $0x30] sm:$0xff] }
  0x4f   :  { %715 = vmatpush3.bf16.msra.mxu1 %v714_v15  ;;  %v90_v23 = vld [vmem:[#allocation5 + $0x48] sm:$0xff]  ;;  %v720_v24 = vpack.c.bf16 %v180_v20, %v179_v19  ;;  %v182_v26 = vld [vmem:[#allocation7 + $0x38] sm:$0xff]  ;;  %v91_v28 = vld [vmem:[#allocation5 + $0x50] sm:$0xff]  ;;  %p890_p7 = por %p889_p6, %p888_p5 }
  0x50   :  { %716 = vmatprep.subr.bf16.mxu1 %v919_v0  ;;  %v702_v27 = vpack.c.bf16 %v90_v23, %v89_v22  ;;  %v92_v29 = vld [vmem:[#allocation5 + $0x58] sm:$0xff]  ;;  %v723_v30 = vpack.c.bf16 %v182_v26, %v181_v25  ;;  %v183_v31 = vld [vmem:[#allocation7 + $0x40] sm:$0xff]  ;;  %v184_v32 = vld [vmem:[#allocation7 + $0x48] sm:$0xff] }
  0x51   :  { %694 = vmatpush3.bf16.msra.mxu0 %v693_v7  ;;  %v705_v33 = vpack.c.bf16 %v92_v29, %v91_v28  ;;  %v93_v34 = vld [vmem:[#allocation5 + $0x60] sm:$0xff]  ;;  %v94_v35 = vld [vmem:[#allocation5 + $0x68] sm:$0xff]  ;;  %v726_v36 = vpack.c.bf16 %v184_v32, %v183_v31  ;;  %v185_v37 = vld [vmem:[#allocation7 + $0x50] sm:$0xff]  ;;  %p891_p8 = pnand %p890_p7, %p884_p4 }
  0x52   :  { %695 = vmatprep.subr.bf16.mxu0 %v919_v0  ;;  %v186_v38 = vld [vmem:[#allocation7 + $0x58] sm:$0xff]  ;;  %v708_v39 = vpack.c.bf16 %v94_v35, %v93_v34  ;;  %v95_v40 = vld [vmem:[#allocation5 + $0x70] sm:$0xff]  ;;  %v187_v43 = vld [vmem:[#allocation7 + $0x60] sm:$0xff] }
  0x53   :  { %718 = vmatpush3.bf16.msra.mxu1 %v717_v18  ;;  %v96_v41 = vld [vmem:[#allocation5 + $0x78] sm:$0xff]  ;;  %v729_v42 = vpack.c.bf16 %v186_v38, %v185_v37  ;;  %v188_v44 = vld [vmem:[#allocation7 + $0x68] sm:$0xff]  ;;  %v189_v48 = vld [vmem:[#allocation7 + $0x70] sm:$0xff] }
  0x54   :  { %719 = vmatprep.subr.bf16.mxu1 %v919_v0  ;;  %v711_v45 = vpack.c.bf16 %v96_v41, %v95_v40  ;;  %v732_v46 = vpack.c.bf16 %v188_v44, %v187_v43  ;;  %v80_v47 = vld [vmem:[#allocation2] sm:$0xff]  ;;  %v270_v51 = vld [vmem:[#allocation7 + $0x80] sm:$0xff]  ;;  %v271_v52 = vld [vmem:[#allocation7 + $0x88] sm:$0xff] }
  0x55   :  { %697 = vmatpush3.bf16.msra.mxu0 %v696_v14  ;;  %v190_v49 = vld [vmem:[#allocation7 + $0x78] sm:$0xff]  ;;  %v272_v53 = vld [vmem:[#allocation7 + $0x90] sm:$0xff]  ;;  %v738_v54 = vpack.c.bf16 %v271_v52, %v270_v51  ;;  %v274_v57 = vld [vmem:[#allocation7 + $0xa0] sm:$0xff] }
  0x56   :  { %698 = vmatprep.subr.bf16.mxu0 %v919_v0  ;;  %v735_v50 = vpack.c.bf16 %v190_v49, %v189_v48  ;;  %v273_v55 = vld [vmem:[#allocation7 + $0x98] sm:$0xff]  ;;  %v275_v58 = vld [vmem:[#allocation7 + $0xa8] sm:$0xff]  ;;  %v276_v60 = vld [vmem:[#allocation7 + $0xb0] sm:$0xff] }
  0x57   :  { %721 = vmatpush3.bf16.msra.mxu1 %v720_v24  ;;  %v741_v56 = vpack.c.bf16 %v273_v55, %v272_v53  ;;  %v744_v59 = vpack.c.bf16 %v275_v58, %v274_v57  ;;  %v277_v61 = vld [vmem:[#allocation7 + $0xb8] sm:$0xff]  ;;  %v278_v63 = vld [vmem:[#allocation7 + $0xc0] sm:$0xff]  ;;  %v279_v2 = vld [vmem:[#allocation7 + $0xc8] sm:$0xff] }
  0x58   :  { %722 = vmatprep.subr.bf16.mxu1 %v919_v0  ;;  %v747_v62 = vpack.c.bf16 %v277_v61, %v276_v60  ;;  %v750_v3 = vpack.c.bf16 %v279_v2, %v278_v63  ;;  %v280_v4 = vld [vmem:[#allocation7 + $0xd0] sm:$0xff]  ;;  %v281_v5 = vld [vmem:[#allocation7 + $0xd8] sm:$0xff]  ;;  %v282_v7 = vld [vmem:[#allocation7 + $0xe0] sm:$0xff] }
  0x59   :  { %700 = vmatpush3.bf16.msra.mxu0 %v699_v21  ;;  %v753_v6 = vpack.c.bf16 %v281_v5, %v280_v4  ;;  %v283_v8 = vld [vmem:[#allocation7 + $0xe8] sm:$0xff]  ;;  %v476_v10 = vld [vmem:[%s1086_s2] ss:$0 sm:$0xff]  ;;  %v284_v15 = vld [vmem:[#allocation7 + $0xf0] sm:$0xff] }
  0x5a   :  { %701 = vmatprep.subr.bf16.mxu0 %v919_v0  ;;  %v756_v9 = vpack.c.bf16 %v283_v8, %v282_v7  ;;  %v285_v16 = vld [vmem:[#allocation7 + $0xf8] sm:$0xff]  ;;  %v365_v18 = vld [vmem:[#allocation8] sm:$0xff]  ;;  %v366_v19 = vld [vmem:[#allocation8 + $0x8] sm:$0xff] }
  0x5b   :  { %724 = vmatpush3.bf16.msra.mxu1 %v723_v30  ;;  %v759_v17 = vpack.c.bf16 %v285_v16, %v284_v15  ;;  %v367_v20 = vld [vmem:[#allocation8 + $0x10] sm:$0xff]  ;;  %v762_v21 = vpack.c.bf16 %v366_v19, %v365_v18  ;;  %v368_v22 = vld [vmem:[#allocation8 + $0x18] sm:$0xff]  ;;  %v369_v24 = vld [vmem:[#allocation8 + $0x20] sm:$0xff] }
  0x5c   :  { %725 = vmatprep.subr.bf16.mxu1 %v919_v0  ;;  %v765_v23 = vpack.c.bf16 %v368_v22, %v367_v20  ;;  %v370_v25 = vld [vmem:[#allocation8 + $0x28] sm:$0xff]  ;;  %v373_v29 = vld [vmem:[#allocation8 + $0x40] sm:$0xff]  ;;  %v375_v32 = vld [vmem:[#allocation8 + $0x50] sm:$0xff] }
  0x5d   :  { %703 = vmatpush3.bf16.msra.mxu0 %v702_v27  ;;  %v768_v26 = vpack.c.bf16 %v370_v25, %v369_v24  ;;  %v372_v27 = vld [vmem:[#allocation8 + $0x38] sm:$0xff]  ;;  %v374_v30 = vld [vmem:[#allocation8 + $0x48] sm:$0xff]  ;;  %v377_v35 = vld [vmem:[#allocation8 + $0x60] sm:$0xff] }
  0x5e   :  { %704 = vmatprep.subr.bf16.mxu0 %v919_v0  ;;  %v774_v31 = vpack.c.bf16 %v374_v30, %v373_v29  ;;  %v477_v38 = vld [vmem:[%s1088_s4] ss:$0 sm:$0xff]  ;;  %v379_v43 = vld [vmem:[#allocation8 + $0x70] sm:$0xff] }
  0x5f   :  { %727 = vmatpush3.bf16.msra.mxu1 %v726_v36  ;;  %v378_v36 = vld [vmem:[#allocation8 + $0x68] sm:$0xff]  ;;  %v380_v44 = vld [vmem:[#allocation8 + $0x78] sm:$0xff] }
  0x60   :  { %728 = vmatprep.subr.bf16.mxu1 %v919_v0  ;;  %v780_v37 = vpack.c.bf16 %v378_v36, %v377_v35 }
  0x61   :  { %706 = vmatpush3.bf16.msra.mxu0 %v705_v33  ;;  %v376_v33 = vld [vmem:[#allocation8 + $0x58] sm:$0xff] }
  0x62   :  { %707 = vmatprep.subr.bf16.mxu0 %v919_v0  ;;  %v777_v34 = vpack.c.bf16 %v376_v33, %v375_v32 }
  0x63   :  { %730 = vmatpush3.bf16.msra.mxu1 %v729_v42 }
  0x64   :  { %731 = vmatprep.subr.bf16.mxu1 %v919_v0 }
  0x65   :  { %709 = vmatpush3.bf16.msra.mxu0 %v708_v39 }
  0x66   :  { %710 = vmatprep.subr.bf16.mxu0 %v919_v0 }
  0x67   :  { %733 = vmatpush3.bf16.msra.mxu1 %v732_v46  ;;  %v479_v46 = vld [vmem:[%s1088_s4 + $0x1] ss:$0 sm:$0xff] }
  0x68   :  { %734 = vmatprep.subr.bf16.mxu1 %v919_v0 }
  0x69   :  { %712 = vmatpush3.bf16.msra.mxu0 %v711_v45  ;;  %v783_v45 = vpack.c.bf16 %v380_v44, %v379_v43 }
  0x6a   :  { %737 = vmatprep.subr.bf16.mxu0 %v919_v0 }
  0x6b   :  { %736 = vmatpush3.bf16.msra.mxu1 %v735_v50  ;;  %v480_v50 = vld [vmem:[%s1090_s6] ss:$0 sm:$0xff] }
  0x6c   :  { %582 = vmatmul.mubr.f32.vlgmr.msra.gmra.mrb[0].mxu0 %v80_v47  ;;  %761 = vmatprep.subr.bf16.mxu1 %v919_v0 }
  0x6d   :  { %651 = vmatprep.mubr.msk.f32.mxu0 %vm920_vm0, %v921_v1  ;;  %739 = vmatpush3.bf16.msra.mxu0 %v738_v54 }
  0x6e   :  { %740 = vmatprep.subr.bf16.mxu0 %v919_v0 }
  0x71   :  { %742 = vmatpush3.bf16.msra.mxu0 %v741_v56 }
  0x72   :  { %743 = vmatprep.subr.bf16.mxu0 %v919_v0 }
  0x75   :  { %745 = vmatpush3.bf16.msra.mxu0 %v744_v59 }
  0x76   :  { %746 = vmatprep.subr.bf16.mxu0 %v919_v0 }
  0x79   :  { %748 = vmatpush3.bf16.msra.mxu0 %v747_v62 }
  0x7a   :  { %749 = vmatprep.subr.bf16.mxu0 %v919_v0 }
  0x7d   :  { %751 = vmatpush3.bf16.msra.mxu0 %v750_v3 }
  0x7e   :  { %752 = vmatprep.subr.bf16.mxu0 %v919_v0 }
  0x81   :  { %754 = vmatpush3.bf16.msra.mxu0 %v753_v6 }
  0x82   :  { %755 = vmatprep.subr.bf16.mxu0 %v919_v0 }
  0x85   :  { %757 = vmatpush3.bf16.msra.mxu0 %v756_v9 }
  0x86   :  { %758 = vmatprep.subr.bf16.mxu0 %v919_v0 }
  0x89   :  { %760 = vmatpush3.bf16.msra.mxu0 %v759_v17 }
 0x13f   :  { %v170_v11 = vpop.f32.mrb[0].mxu0 }
 0x140   :  { %v171_v12 = vadd.f32 %v476_v10, %v170_v11  ;;  %v583_v13 = vpop.f32.mrb[1].mxu0 }
 0x142   :  { %v174_v14 = vmax.f32 %v171_v12, 0.0 }
 0x144   :  { %617 = vmatmul.mubr.f32.vlgmr.msra.gmra.mrb[0].mxu1 %v174_v14 }
 0x145   :  { %686 = vmatprep.mubr.msk.f32.mxu1 %vm920_vm0, %v921_v1  ;;  %763 = vmatpush3.bf16.msra.mxu1 %v762_v21  ;;  %v371_v1 = vld [vmem:[#allocation8 + $0x30] sm:$0xff] }
 0x146   :  { %764 = vmatprep.subr.bf16.mxu1 %v919_v0  ;;  %v771_v28 = vpack.c.bf16 %v372_v27, %v371_v1 }
 0x149   :  { %766 = vmatpush3.bf16.msra.mxu1 %v765_v23 }
 0x14a   :  { %767 = vmatprep.subr.bf16.mxu1 %v919_v0 }
 0x14d   :  { %769 = vmatpush3.bf16.msra.mxu1 %v768_v26 }
 0x14e   :  { %770 = vmatprep.subr.bf16.mxu1 %v919_v0 }
 0x151   :  { %772 = vmatpush3.bf16.msra.mxu1 %v771_v28 }
 0x152   :  { %773 = vmatprep.subr.bf16.mxu1 %v919_v0 }
 0x155   :  { %775 = vmatpush3.bf16.msra.mxu1 %v774_v31 }
 0x156   :  { %776 = vmatprep.subr.bf16.mxu1 %v919_v0 }
 0x159   :  { %778 = vmatpush3.bf16.msra.mxu1 %v777_v34 }
 0x15a   :  { %779 = vmatprep.subr.bf16.mxu1 %v919_v0 }
 0x15d   :  { %781 = vmatpush3.bf16.msra.mxu1 %v780_v37 }
 0x15e   :  { %782 = vmatprep.subr.bf16.mxu1 %v919_v0 }
 0x161   :  { %784 = vmatpush3.bf16.msra.mxu1 %v783_v45 }
 0x217   :  { %v264_v39 = vpop.f32.mrb[0].mxu1 }
 0x218   :  { %v265_v40 = vadd.f32 %v477_v38, %v264_v39  ;;  %v618_v41 = vpop.f32.mrb[1].mxu1 }
 0x21a   :  { %v268_v42 = vmax.f32 %v265_v40, 0.0 }
 0x21c   :  { %652 = vmatmul.mubr.f32.vlgmr.msra.gmra.mrb[2].mxu0 %v268_v42 }
 0x2ef   :  { %v360_v47 = vpop.f32.mrb[2].mxu0 }
 0x2f0   :  { %v361_v48 = vadd.f32 %v479_v46, %v360_v47  ;;  %v653_v0 = vpop.f32.mrb[3].mxu0 }
 0x2f2   :  { %v364_v49 = vmax.f32 %v361_v48, 0.0 }
 0x2f4   :  { %687 = vmatmul.mubr.f32.vlgmr.msra.gmra.mrb[2].mxu1 %v364_v49 }
 0x3c7   :  { %v454_v51 = vpop.f32.mrb[2].mxu1 }
 0x3c8   :  { %v455_v52 = vadd.f32 %v480_v50, %v454_v51  ;;  %v688_v53 = vpop.f32.mrb[3].mxu1 }
 0x3ca   :  { %458 = vst [vmem:[#allocation10] sm:$0xff] %v455_v52 }
 0x3cb   :  { %894 = shalt.err (!%p891_p8)
}
 0x3cc   :  { %s895_s13 = scalar_lea.hbm %s1091_s7, 128 }
 0x3cd   :  { %p896_p9 = scmp.ne.s32.totalorder %s1091_s7, %s895_s13  ;;  %p899_p10 = scmp.lt.u32.totalorder %s895_s13, %s1091_s7 }
 0x3cf   :  { %p901_p11 = pnand %p899_p10, %p896_p9 }
 0x3d1   :  { %904 = shalt.err (!%p901_p11)
}
 0x3d2   :  { %468 = dma.vmem_to_hbm [thread:$0]  %s466_s8, 128, %s1091_s7, [#allocation4]  }
 0x3d3   :  { %911 = dma.done.wait [#allocation4], 128  }
 0x3d4   :  { %912 = vsyncadd [#allocation4], 4294967168 }
 0x3d5   :  { %472 = vsyncpa [#allocation3], 1 }
 0x3d6   :  { %473 = vsyncpa [#allocation6], 1 }
 0x3d7   :  { %474 = vsyncpa [#allocation9], 1 }
 0x3d8   :  { %475 = vsyncpa [#allocation4], 1 }

</bundles_post_ra>
